<compile_context>
chip_gen: v7x
topology: tpu7x:2x2x1
jax: 0.10.0
libtpu: 0.0.40
codegen_flags: <defaults>
</compile_context>

<pallas_src>
import functools

import jax
import jax.numpy as jnp
from jax.experimental import pallas as pl
from jax.experimental.pallas import tpu as pltpu

LANE = 128          # TPU lane width
ROWS = 256          # tokens per grid step (multiple of 8); review suggested 256-1024
NCORES = 2          # leading "parallel" axis (v7x megacore); harmless on 1-TC chips
_ISSUE_UNROLL = 8   # manual unroll of the DMA-issue loop


def _reward_criterion_kernel(n_tok, rows, tiles_per_core,
                             slab_ref,   # SMEM (ncores*tiles_per_core*rows,) i32 (prefetch)
                             sel_ref,    # VMEM (1, 1, rows, 1) i32  in-slab token offset
                             w_ref,      # VMEM (1, 1, rows, 1) f32  -reward*mask (0 on pad)
                             inp_ref,    # ANY  (n_tok, Vp)          stays in HBM
                             out_ref,    # VMEM (1, 1, 1) f32        per-core partial sum
                             buf,        # VMEM (2, rows, LANE)      gather double buffer
                             sems):      # DMA  (2,)                 one semaphore per slot
    c = pl.program_id(0)            # core-split axis ("parallel")
    j = pl.program_id(1)            # token-tile axis within this core ("arbitrary")
    slot = j & 1

    def issue(tile, dst_slot):
        """Issue `rows` gather DMAs (one 128-lane slab per token) into buf[dst_slot]."""
        base = tile * rows

        def body(k, carry):
            for u in range(_ISSUE_UNROLL):                  # small manual unroll
                r = k * _ISSUE_UNROLL + u
                p = base + r
                src_row = jnp.minimum(p, n_tok - 1)          # clamp padded tokens (w == 0 there)
                src_col = pl.multiple_of(slab_ref[p] * LANE, LANE)
                pltpu.make_async_copy(
                    inp_ref.at[pl.ds(src_row, 1), pl.ds(src_col, LANE)],
                    buf.at[dst_slot, pl.ds(r, 1), :],
                    sems.at[dst_slot],                       # shared per-slot semaphore
                ).start()
            return carry

        jax.lax.fori_loop(0, rows // _ISSUE_UNROLL, body, 0)

    @pl.when(j == 0)
    def _():
        out_ref[...] = jnp.zeros_like(out_ref)
        issue(c * tiles_per_core, 0)                         # prime slot 0 for this core

    # Single batched wait for this tile's gathers.  The descriptor covers the
    # whole (rows, LANE) destination slot, so its byte count equals the sum of
    # the `rows` issued (1, LANE) copies that signalled this semaphore; wait()
    # only consumes the semaphore / byte count and never reads the src ref.
    pltpu.make_async_copy(buf.at[slot], buf.at[slot], sems.at[slot]).wait()

    # Prefetch the next tile only after the wait (bounds in-flight descriptors
    # to ~one tile); its DMAs overlap with the compute below.
    @pl.when(j + 1 < tiles_per_core)
    def _():
        issue(c * tiles_per_core + j + 1, (j + 1) & 1)

    vals = buf[slot]                                         # (rows, LANE), input dtype
    lanes = jax.lax.broadcasted_iota(jnp.int32, (rows, LANE), 1)
    sel = sel_ref[0, 0]                                      # (rows, 1) in-slab offset
    gathered = jnp.sum(jnp.where(lanes == sel, vals, jnp.zeros_like(vals)),
                       axis=-1, keepdims=True).astype(jnp.float32)   # (rows, 1)
    out_ref[...] += jnp.sum(gathered * w_ref[0, 0], keepdims=True).reshape(1, 1, 1)


def reward_criterion(inp, seq, reward, *, rows=ROWS, ncores=NCORES):
    """inp: (B, T, V) float log-probs, seq: (B, T) int, reward: (B, T) float -> scalar f32."""
    B, T, V = inp.shape
    N = B * T

    # Pad vocab to a lane multiple so every 128-lane slab is in bounds
    # (real vocab sizes are usually multiples of 128, making this a no-op).
    v_pad = (-V) % LANE
    if v_pad:
        inp = jnp.pad(inp, ((0, 0), (0, 0), (0, v_pad)))
    inp_flat = inp.reshape(N, V + v_pad)

    seq = seq.astype(jnp.int32)
    # Shifted mask (built on the full (B, T), so tiling is boundary-safe):
    #   mask[:, 0] = 1, mask[:, t] = (seq[:, t-1] > 0)
    mask = jnp.concatenate(
        [jnp.ones((B, 1), jnp.float32), (seq[:, :-1] > 0).astype(jnp.float32)],
        axis=1)
    # Fold -reward*mask into one per-token weight; sum(mask) applied in wrapper.
    w = -reward.astype(jnp.float32) * mask
    msum = jnp.sum(mask)

    # Don't over-tile tiny inputs; keep rows a multiple of 8 (sublane width).
    rows = max(8, min(rows, pl.cdiv(N, 8) * 8))
    assert rows % _ISSUE_UNROLL == 0
    tiles = pl.cdiv(N, rows)
    tpc = pl.cdiv(tiles, ncores)           # token tiles per core
    total = ncores * tpc * rows            # padded token count
    pad = total - N

    def pad1d(x):
        return jnp.pad(x.reshape(-1), (0, pad))

    # NOTE: the slab table is scalar-prefetched into SMEM; for extremely large
    # B*T (hundreds of thousands of tokens) it would need to be chunked.
    slab = pad1d(seq // LANE).astype(jnp.int32)                               # (total,)
    sel = pad1d(seq % LANE).astype(jnp.int32).reshape(ncores, tpc, rows, 1)   # in-slab offset
    wv = pad1d(w).reshape(ncores, tpc, rows, 1)                               # padded rows -> 0

    kernel = functools.partial(_reward_criterion_kernel, N, rows, tpc)

    out = pl.pallas_call(
        kernel,
        out_shape=jax.ShapeDtypeStruct((ncores, 1, 1), jnp.float32),
        grid_spec=pltpu.PrefetchScalarGridSpec(
            num_scalar_prefetch=1,
            grid=(ncores, tpc),
            in_specs=[
                pl.BlockSpec((1, 1, rows, 1), lambda c, j, s: (c, j, 0, 0)),  # sel
                pl.BlockSpec((1, 1, rows, 1), lambda c, j, s: (c, j, 0, 0)),  # weight
                pl.BlockSpec(memory_space=pl.ANY),                            # input, stays in HBM
            ],
            out_specs=pl.BlockSpec((1, 1, 1), lambda c, j, s: (c, 0, 0)),
            scratch_shapes=[
                pltpu.VMEM((2, rows, LANE), inp_flat.dtype),  # gather double buffer
                pltpu.SemaphoreType.DMA((2,)),                # one semaphore per slot
            ],
        ),
        compiler_params=pltpu.CompilerParams(
            dimension_semantics=("parallel", "arbitrary"),
        ),
    )(slab, sel, wv, inp_flat)

    return jnp.sum(out) / msum


def _reference(inp, seq, reward):
    gathered = jnp.take_along_axis(inp, seq[:, :, None], axis=2)[:, :, 0]
    m = (seq > 0).astype(jnp.float32)
    mask = jnp.concatenate([jnp.ones((seq.shape[0], 1), jnp.float32), m[:, :-1]], axis=1)
    return jnp.sum(-gathered * reward * mask) / jnp.sum(mask)


if __name__ == "__main__":
    B, T, V = 2, 8, 32
    key = jax.random.PRNGKey(0)
    k1, k2, k3 = jax.random.split(key, 3)

    logits = jax.random.normal(k1, (B, T, V), dtype=jnp.float32)
    logprobs = jax.nn.log_softmax(logits, axis=-1)
    # sampled token ids; include zeros so the shifted mask is non-trivial
    seq = jax.random.randint(k2, (B, T), minval=0, maxval=V, dtype=jnp.int32)
    seq = seq.at[:, -2:].set(0)
    reward = jax.random.normal(k3, (B, T), dtype=jnp.float32)

    out = reward_criterion(logprobs, seq, reward)
    jax.block_until_ready(out)

    ref = _reference(logprobs, seq, reward)
    assert jnp.allclose(out, ref, rtol=1e-5, atol=1e-5), (out, ref)

    print("KERNEL_OK")
</pallas_src>

<mosaic_0001>
module attributes {stable_mosaic.version = 11 : i64} {
  func.func @_reward_criterion_kernel(%arg0: i32, %arg1: i32, %arg2: memref<32xi32, #tpu.memory_space<smem>>, %arg3: memref<1x1x16x1xi32, #tpu.memory_space<vmem>>, %arg4: memref<1x1x16x1xf32, #tpu.memory_space<vmem>>, %arg5: memref<16x128xf32, #tpu.memory_space<any>>, %arg6: memref<1x1x1xf32, #tpu.memory_space<vmem>>, %arg7: memref<2x16x128xf32, #tpu.memory_space<vmem>>, %arg8: memref<2x!tpu.dma_semaphore, #tpu.memory_space<semaphore_mem>>) attributes {dimension_semantics = [#tpu.dimension_semantics<parallel>, #tpu.dimension_semantics<arbitrary>], iteration_bounds = array<i64: 2, 1>, scalar_prefetch = 1 : i64, scratch_operands = 2 : i64, tpu.core_type = #tpu.core_type<tc>, window_params = [{transform_indices = @transform_0, window_bounds = array<i64: 1, 1, 16, 1>}, {transform_indices = @transform_1, window_bounds = array<i64: 1, 1, 16, 1>}, {}, {transform_indices = @transform_3, window_bounds = array<i64: 1, 1, 1>}]} {
    %c1_i32 = arith.constant 1 : i32
    %0 = arith.andi %arg1, %c1_i32 : i32
    %c0_i32 = arith.constant 0 : i32
    %1 = arith.cmpi eq, %arg1, %c0_i32 : i32
    %2 = arith.extui %1 : i1 to i32
    %c0_i32_0 = arith.constant 0 : i32
    %3 = arith.cmpi ne, %2, %c0_i32_0 : i32
    scf.if %3 {
      %cst_25 = arith.constant 0.000000e+00 : f32
      %38 = vector.broadcast %cst_25 : f32 to vector<1x1x1xf32>
      %c0_26 = arith.constant 0 : index
      %c0_27 = arith.constant 0 : index
      %c0_28 = arith.constant 0 : index
      %39 = vector.load %arg6[%c0_26, %c0_27, %c0_28] : memref<1x1x1xf32, #tpu.memory_space<vmem>>, vector<1x1x1xf32>
      tpu.vector_store %arg6[%c0_26, %c0_27, %c0_28], %38 {strides = array<i32>} : memref<1x1x1xf32, #tpu.memory_space<vmem>>, vector<1x1x1xf32>,
      %c1_i32_29 = arith.constant 1 : i32
      %40 = arith.muli %arg0, %c1_i32_29 : i32
      %c16_i32 = arith.constant 16 : i32
      %41 = arith.muli %40, %c16_i32 : i32
      %c0_i32_30 = arith.constant 0 : i32
      %c2_i32 = arith.constant 2 : i32
      %42 = arith.addi %c0_i32_30, %c2_i32 : i32
      %c1_i32_31 = arith.constant 1 : i32
      scf.for %arg9 = %c0_i32_30 to %42 step %c1_i32_31  : i32 {
        %c8_i32 = arith.constant 8 : i32
        %43 = arith.muli %arg9, %c8_i32 : i32
        %c0_i32_33 = arith.constant 0 : i32
        %44 = arith.addi %43, %c0_i32_33 : i32
        %45 = arith.addi %41, %44 : i32
        %c15_i32 = arith.constant 15 : i32
        %46 = arith.minsi %45, %c15_i32 : i32
        %47 = arith.index_cast %45 : i32 to index
        %48 = memref.load %arg2[%47] : memref<32xi32, #tpu.memory_space<smem>>
        %c128_i32 = arith.constant 128 : i32
        %49 = arith.muli %48, %c128_i32 : i32
        %50 = tpu.assume_multiple %49, 128 : i32
        %c0_i32_34 = arith.constant 0 : i32
        %c0_i32_35 = arith.constant 0 : i32
        %51 = tpu.memref_slice %arg5[%46, %50] : memref<16x128xf32, #tpu.memory_space<any>> -> memref<1x128xf32, #tpu.memory_space<any>>
        %c0_i32_36 = arith.constant 0 : i32
        %52 = tpu.memref_slice %arg7[%c0_i32_34, %44, %c0_i32_36] : memref<2x16x128xf32, #tpu.memory_space<vmem>> -> memref<1x1x128xf32, #tpu.memory_space<vmem>>
        %53 = tpu.memref_squeeze %52 : memref<1x1x128xf32, #tpu.memory_space<vmem>> -> memref<1x128xf32, #tpu.memory_space<vmem>>
        %54 = tpu.memref_slice %arg8[%c0_i32_35] : memref<2x!tpu.dma_semaphore, #tpu.memory_space<semaphore_mem>> -> memref<1x!tpu.dma_semaphore, #tpu.memory_space<semaphore_mem>>
        %55 = tpu.memref_squeeze %54 : memref<1x!tpu.dma_semaphore, #tpu.memory_space<semaphore_mem>> -> memref<!tpu.dma_semaphore, #tpu.memory_space<semaphore_mem>>
        tpu.enqueue_dma source(%51 : memref<1x128xf32, #tpu.memory_space<any>>) target(%53 : memref<1x128xf32, #tpu.memory_space<vmem>>) target_semaphore(%55 : memref<!tpu.dma_semaphore, #tpu.memory_space<semaphore_mem>>)
        %c8_i32_37 = arith.constant 8 : i32
        %56 = arith.muli %arg9, %c8_i32_37 : i32
        %c1_i32_38 = arith.constant 1 : i32
        %57 = arith.addi %56, %c1_i32_38 : i32
        %58 = arith.addi %41, %57 : i32
        %c15_i32_39 = arith.constant 15 : i32
        %59 = arith.minsi %58, %c15_i32_39 : i32
        %60 = arith.index_cast %58 : i32 to index
        %61 = memref.load %arg2[%60] : memref<32xi32, #tpu.memory_space<smem>>
        %c128_i32_40 = arith.constant 128 : i32
        %62 = arith.muli %61, %c128_i32_40 : i32
        %63 = tpu.assume_multiple %62, 128 : i32
        %c0_i32_41 = arith.constant 0 : i32
        %c0_i32_42 = arith.constant 0 : i32
        %64 = tpu.memref_slice %arg5[%59, %63] : memref<16x128xf32, #tpu.memory_space<any>> -> memref<1x128xf32, #tpu.memory_space<any>>
        %c0_i32_43 = arith.constant 0 : i32
        %65 = tpu.memref_slice %arg7[%c0_i32_41, %57, %c0_i32_43] : memref<2x16x128xf32, #tpu.memory_space<vmem>> -> memref<1x1x128xf32, #tpu.memory_space<vmem>>
        %66 = tpu.memref_squeeze %65 : memref<1x1x128xf32, #tpu.memory_space<vmem>> -> memref<1x128xf32, #tpu.memory_space<vmem>>
        %67 = tpu.memref_slice %arg8[%c0_i32_42] : memref<2x!tpu.dma_semaphore, #tpu.memory_space<semaphore_mem>> -> memref<1x!tpu.dma_semaphore, #tpu.memory_space<semaphore_mem>>
        %68 = tpu.memref_squeeze %67 : memref<1x!tpu.dma_semaphore, #tpu.memory_space<semaphore_mem>> -> memref<!tpu.dma_semaphore, #tpu.memory_space<semaphore_mem>>
        tpu.enqueue_dma source(%64 : memref<1x128xf32, #tpu.memory_space<any>>) target(%66 : memref<1x128xf32, #tpu.memory_space<vmem>>) target_semaphore(%68 : memref<!tpu.dma_semaphore, #tpu.memory_space<semaphore_mem>>)
        %c8_i32_44 = arith.constant 8 : i32
        %69 = arith.muli %arg9, %c8_i32_44 : i32
        %c2_i32_45 = arith.constant 2 : i32
        %70 = arith.addi %69, %c2_i32_45 : i32
        %71 = arith.addi %41, %70 : i32
        %c15_i32_46 = arith.constant 15 : i32
        %72 = arith.minsi %71, %c15_i32_46 : i32
        %73 = arith.index_cast %71 : i32 to index
        %74 = memref.load %arg2[%73] : memref<32xi32, #tpu.memory_space<smem>>
        %c128_i32_47 = arith.constant 128 : i32
        %75 = arith.muli %74, %c128_i32_47 : i32
        %76 = tpu.assume_multiple %75, 128 : i32
        %c0_i32_48 = arith.constant 0 : i32
        %c0_i32_49 = arith.constant 0 : i32
        %77 = tpu.memref_slice %arg5[%72, %76] : memref<16x128xf32, #tpu.memory_space<any>> -> memref<1x128xf32, #tpu.memory_space<any>>
        %c0_i32_50 = arith.constant 0 : i32
        %78 = tpu.memref_slice %arg7[%c0_i32_48, %70, %c0_i32_50] : memref<2x16x128xf32, #tpu.memory_space<vmem>> -> memref<1x1x128xf32, #tpu.memory_space<vmem>>
        %79 = tpu.memref_squeeze %78 : memref<1x1x128xf32, #tpu.memory_space<vmem>> -> memref<1x128xf32, #tpu.memory_space<vmem>>
        %80 = tpu.memref_slice %arg8[%c0_i32_49] : memref<2x!tpu.dma_semaphore, #tpu.memory_space<semaphore_mem>> -> memref<1x!tpu.dma_semaphore, #tpu.memory_space<semaphore_mem>>
        %81 = tpu.memref_squeeze %80 : memref<1x!tpu.dma_semaphore, #tpu.memory_space<semaphore_mem>> -> memref<!tpu.dma_semaphore, #tpu.memory_space<semaphore_mem>>
        tpu.enqueue_dma source(%77 : memref<1x128xf32, #tpu.memory_space<any>>) target(%79 : memref<1x128xf32, #tpu.memory_space<vmem>>) target_semaphore(%81 : memref<!tpu.dma_semaphore, #tpu.memory_space<semaphore_mem>>)
        %c8_i32_51 = arith.constant 8 : i32
        %82 = arith.muli %arg9, %c8_i32_51 : i32
        %c3_i32 = arith.constant 3 : i32
        %83 = arith.addi %82, %c3_i32 : i32
        %84 = arith.addi %41, %83 : i32
        %c15_i32_52 = arith.constant 15 : i32
        %85 = arith.minsi %84, %c15_i32_52 : i32
        %86 = arith.index_cast %84 : i32 to index
        %87 = memref.load %arg2[%86] : memref<32xi32, #tpu.memory_space<smem>>
        %c128_i32_53 = arith.constant 128 : i32
        %88 = arith.muli %87, %c128_i32_53 : i32
        %89 = tpu.assume_multiple %88, 128 : i32
        %c0_i32_54 = arith.constant 0 : i32
        %c0_i32_55 = arith.constant 0 : i32
        %90 = tpu.memref_slice %arg5[%85, %89] : memref<16x128xf32, #tpu.memory_space<any>> -> memref<1x128xf32, #tpu.memory_space<any>>
        %c0_i32_56 = arith.constant 0 : i32
        %91 = tpu.memref_slice %arg7[%c0_i32_54, %83, %c0_i32_56] : memref<2x16x128xf32, #tpu.memory_space<vmem>> -> memref<1x1x128xf32, #tpu.memory_space<vmem>>
        %92 = tpu.memref_squeeze %91 : memref<1x1x128xf32, #tpu.memory_space<vmem>> -> memref<1x128xf32, #tpu.memory_space<vmem>>
        %93 = tpu.memref_slice %arg8[%c0_i32_55] : memref<2x!tpu.dma_semaphore, #tpu.memory_space<semaphore_mem>> -> memref<1x!tpu.dma_semaphore, #tpu.memory_space<semaphore_mem>>
        %94 = tpu.memref_squeeze %93 : memref<1x!tpu.dma_semaphore, #tpu.memory_space<semaphore_mem>> -> memref<!tpu.dma_semaphore, #tpu.memory_space<semaphore_mem>>
        tpu.enqueue_dma source(%90 : memref<1x128xf32, #tpu.memory_space<any>>) target(%92 : memref<1x128xf32, #tpu.memory_space<vmem>>) target_semaphore(%94 : memref<!tpu.dma_semaphore, #tpu.memory_space<semaphore_mem>>)
        %c8_i32_57 = arith.constant 8 : i32
        %95 = arith.muli %arg9, %c8_i32_57 : i32
        %c4_i32 = arith.constant 4 : i32
        %96 = arith.addi %95, %c4_i32 : i32
        %97 = arith.addi %41, %96 : i32
        %c15_i32_58 = arith.constant 15 : i32
        %98 = arith.minsi %97, %c15_i32_58 : i32
        %99 = arith.index_cast %97 : i32 to index
        %100 = memref.load %arg2[%99] : memref<32xi32, #tpu.memory_space<smem>>
        %c128_i32_59 = arith.constant 128 : i32
        %101 = arith.muli %100, %c128_i32_59 : i32
        %102 = tpu.assume_multiple %101, 128 : i32
        %c0_i32_60 = arith.constant 0 : i32
        %c0_i32_61 = arith.constant 0 : i32
        %103 = tpu.memref_slice %arg5[%98, %102] : memref<16x128xf32, #tpu.memory_space<any>> -> memref<1x128xf32, #tpu.memory_space<any>>
        %c0_i32_62 = arith.constant 0 : i32
        %104 = tpu.memref_slice %arg7[%c0_i32_60, %96, %c0_i32_62] : memref<2x16x128xf32, #tpu.memory_space<vmem>> -> memref<1x1x128xf32, #tpu.memory_space<vmem>>
        %105 = tpu.memref_squeeze %104 : memref<1x1x128xf32, #tpu.memory_space<vmem>> -> memref<1x128xf32, #tpu.memory_space<vmem>>
        %106 = tpu.memref_slice %arg8[%c0_i32_61] : memref<2x!tpu.dma_semaphore, #tpu.memory_space<semaphore_mem>> -> memref<1x!tpu.dma_semaphore, #tpu.memory_space<semaphore_mem>>
        %107 = tpu.memref_squeeze %106 : memref<1x!tpu.dma_semaphore, #tpu.memory_space<semaphore_mem>> -> memref<!tpu.dma_semaphore, #tpu.memory_space<semaphore_mem>>
        tpu.enqueue_dma source(%103 : memref<1x128xf32, #tpu.memory_space<any>>) target(%105 : memref<1x128xf32, #tpu.memory_space<vmem>>) target_semaphore(%107 : memref<!tpu.dma_semaphore, #tpu.memory_space<semaphore_mem>>)
        %c8_i32_63 = arith.constant 8 : i32
        %108 = arith.muli %arg9, %c8_i32_63 : i32
        %c5_i32 = arith.constant 5 : i32
        %109 = arith.addi %108, %c5_i32 : i32
        %110 = arith.addi %41, %109 : i32
        %c15_i32_64 = arith.constant 15 : i32
        %111 = arith.minsi %110, %c15_i32_64 : i32
        %112 = arith.index_cast %110 : i32 to index
        %113 = memref.load %arg2[%112] : memref<32xi32, #tpu.memory_space<smem>>
        %c128_i32_65 = arith.constant 128 : i32
        %114 = arith.muli %113, %c128_i32_65 : i32
        %115 = tpu.assume_multiple %114, 128 : i32
        %c0_i32_66 = arith.constant 0 : i32
        %c0_i32_67 = arith.constant 0 : i32
        %116 = tpu.memref_slice %arg5[%111, %115] : memref<16x128xf32, #tpu.memory_space<any>> -> memref<1x128xf32, #tpu.memory_space<any>>
        %c0_i32_68 = arith.constant 0 : i32
        %117 = tpu.memref_slice %arg7[%c0_i32_66, %109, %c0_i32_68] : memref<2x16x128xf32, #tpu.memory_space<vmem>> -> memref<1x1x128xf32, #tpu.memory_space<vmem>>
        %118 = tpu.memref_squeeze %117 : memref<1x1x128xf32, #tpu.memory_space<vmem>> -> memref<1x128xf32, #tpu.memory_space<vmem>>
        %119 = tpu.memref_slice %arg8[%c0_i32_67] : memref<2x!tpu.dma_semaphore, #tpu.memory_space<semaphore_mem>> -> memref<1x!tpu.dma_semaphore, #tpu.memory_space<semaphore_mem>>
        %120 = tpu.memref_squeeze %119 : memref<1x!tpu.dma_semaphore, #tpu.memory_space<semaphore_mem>> -> memref<!tpu.dma_semaphore, #tpu.memory_space<semaphore_mem>>
        tpu.enqueue_dma source(%116 : memref<1x128xf32, #tpu.memory_space<any>>) target(%118 : memref<1x128xf32, #tpu.memory_space<vmem>>) target_semaphore(%120 : memref<!tpu.dma_semaphore, #tpu.memory_space<semaphore_mem>>)
        %c8_i32_69 = arith.constant 8 : i32
        %121 = arith.muli %arg9, %c8_i32_69 : i32
        %c6_i32 = arith.constant 6 : i32
        %122 = arith.addi %121, %c6_i32 : i32
        %123 = arith.addi %41, %122 : i32
        %c15_i32_70 = arith.constant 15 : i32
        %124 = arith.minsi %123, %c15_i32_70 : i32
        %125 = arith.index_cast %123 : i32 to index
        %126 = memref.load %arg2[%125] : memref<32xi32, #tpu.memory_space<smem>>
        %c128_i32_71 = arith.constant 128 : i32
        %127 = arith.muli %126, %c128_i32_71 : i32
        %128 = tpu.assume_multiple %127, 128 : i32
        %c0_i32_72 = arith.constant 0 : i32
        %c0_i32_73 = arith.constant 0 : i32
        %129 = tpu.memref_slice %arg5[%124, %128] : memref<16x128xf32, #tpu.memory_space<any>> -> memref<1x128xf32, #tpu.memory_space<any>>
        %c0_i32_74 = arith.constant 0 : i32
        %130 = tpu.memref_slice %arg7[%c0_i32_72, %122, %c0_i32_74] : memref<2x16x128xf32, #tpu.memory_space<vmem>> -> memref<1x1x128xf32, #tpu.memory_space<vmem>>
        %131 = tpu.memref_squeeze %130 : memref<1x1x128xf32, #tpu.memory_space<vmem>> -> memref<1x128xf32, #tpu.memory_space<vmem>>
        %132 = tpu.memref_slice %arg8[%c0_i32_73] : memref<2x!tpu.dma_semaphore, #tpu.memory_space<semaphore_mem>> -> memref<1x!tpu.dma_semaphore, #tpu.memory_space<semaphore_mem>>
        %133 = tpu.memref_squeeze %132 : memref<1x!tpu.dma_semaphore, #tpu.memory_space<semaphore_mem>> -> memref<!tpu.dma_semaphore, #tpu.memory_space<semaphore_mem>>
        tpu.enqueue_dma source(%129 : memref<1x128xf32, #tpu.memory_space<any>>) target(%131 : memref<1x128xf32, #tpu.memory_space<vmem>>) target_semaphore(%133 : memref<!tpu.dma_semaphore, #tpu.memory_space<semaphore_mem>>)
        %c8_i32_75 = arith.constant 8 : i32
        %134 = arith.muli %arg9, %c8_i32_75 : i32
        %c7_i32 = arith.constant 7 : i32
        %135 = arith.addi %134, %c7_i32 : i32
        %136 = arith.addi %41, %135 : i32
        %c15_i32_76 = arith.constant 15 : i32
        %137 = arith.minsi %136, %c15_i32_76 : i32
        %138 = arith.index_cast %136 : i32 to index
        %139 = memref.load %arg2[%138] : memref<32xi32, #tpu.memory_space<smem>>
        %c128_i32_77 = arith.constant 128 : i32
        %140 = arith.muli %139, %c128_i32_77 : i32
        %141 = tpu.assume_multiple %140, 128 : i32
        %c0_i32_78 = arith.constant 0 : i32
        %c0_i32_79 = arith.constant 0 : i32
        %142 = tpu.memref_slice %arg5[%137, %141] : memref<16x128xf32, #tpu.memory_space<any>> -> memref<1x128xf32, #tpu.memory_space<any>>
        %c0_i32_80 = arith.constant 0 : i32
        %143 = tpu.memref_slice %arg7[%c0_i32_78, %135, %c0_i32_80] : memref<2x16x128xf32, #tpu.memory_space<vmem>> -> memref<1x1x128xf32, #tpu.memory_space<vmem>>
        %144 = tpu.memref_squeeze %143 : memref<1x1x128xf32, #tpu.memory_space<vmem>> -> memref<1x128xf32, #tpu.memory_space<vmem>>
        %145 = tpu.memref_slice %arg8[%c0_i32_79] : memref<2x!tpu.dma_semaphore, #tpu.memory_space<semaphore_mem>> -> memref<1x!tpu.dma_semaphore, #tpu.memory_space<semaphore_mem>>
        %146 = tpu.memref_squeeze %145 : memref<1x!tpu.dma_semaphore, #tpu.memory_space<semaphore_mem>> -> memref<!tpu.dma_semaphore, #tpu.memory_space<semaphore_mem>>
        tpu.enqueue_dma source(%142 : memref<1x128xf32, #tpu.memory_space<any>>) target(%144 : memref<1x128xf32, #tpu.memory_space<vmem>>) target_semaphore(%146 : memref<!tpu.dma_semaphore, #tpu.memory_space<semaphore_mem>>)
      }
      %c2_i32_32 = arith.constant 2 : i32
    } else {
    }
    %c0_i32_1 = arith.constant 0 : i32
    %c0_i32_2 = arith.constant 0 : i32
    %4 = tpu.memref_slice %arg7[%0, %c0_i32_1, %c0_i32_2] : memref<2x16x128xf32, #tpu.memory_space<vmem>> -> memref<1x16x128xf32, #tpu.memory_space<vmem>>
    %5 = tpu.memref_squeeze %4 : memref<1x16x128xf32, #tpu.memory_space<vmem>> -> memref<16x128xf32, #tpu.memory_space<vmem>>
    %c0_i32_3 = arith.constant 0 : i32
    %c0_i32_4 = arith.constant 0 : i32
    %6 = tpu.memref_slice %arg7[%0, %c0_i32_3, %c0_i32_4] : memref<2x16x128xf32, #tpu.memory_space<vmem>> -> memref<1x16x128xf32, #tpu.memory_space<vmem>>
    %7 = tpu.memref_squeeze %6 : memref<1x16x128xf32, #tpu.memory_space<vmem>> -> memref<16x128xf32, #tpu.memory_space<vmem>>
    %8 = tpu.memref_slice %arg8[%0] : memref<2x!tpu.dma_semaphore, #tpu.memory_space<semaphore_mem>> -> memref<1x!tpu.dma_semaphore, #tpu.memory_space<semaphore_mem>>
    %9 = tpu.memref_squeeze %8 : memref<1x!tpu.dma_semaphore, #tpu.memory_space<semaphore_mem>> -> memref<!tpu.dma_semaphore, #tpu.memory_space<semaphore_mem>>
    tpu.wait_dma2 semaphore(%9 : memref<!tpu.dma_semaphore, #tpu.memory_space<semaphore_mem>>) src(%5 : memref<16x128xf32, #tpu.memory_space<vmem>>) dst(%7 : memref<16x128xf32, #tpu.memory_space<vmem>>)
    %c1_i32_5 = arith.constant 1 : i32
    %10 = arith.addi %arg1, %c1_i32_5 : i32
    %c1_i32_6 = arith.constant 1 : i32
    %11 = arith.cmpi slt, %10, %c1_i32_6 : i32
    %12 = arith.extui %11 : i1 to i32
    %c0_i32_7 = arith.constant 0 : i32
    %13 = arith.cmpi ne, %12, %c0_i32_7 : i32
    scf.if %13 {
      %c1_i32_25 = arith.constant 1 : i32
      %38 = arith.muli %arg0, %c1_i32_25 : i32
      %39 = arith.addi %38, %arg1 : i32
      %c1_i32_26 = arith.constant 1 : i32
      %40 = arith.addi %39, %c1_i32_26 : i32
      %c1_i32_27 = arith.constant 1 : i32
      %41 = arith.addi %arg1, %c1_i32_27 : i32
      %c1_i32_28 = arith.constant 1 : i32
      %42 = arith.andi %41, %c1_i32_28 : i32
      %c16_i32 = arith.constant 16 : i32
      %43 = arith.muli %40, %c16_i32 : i32
      %c0_i32_29 = arith.constant 0 : i32
      %c2_i32 = arith.constant 2 : i32
      %44 = arith.addi %c0_i32_29, %c2_i32 : i32
      %c1_i32_30 = arith.constant 1 : i32
      scf.for %arg9 = %c0_i32_29 to %44 step %c1_i32_30  : i32 {
        %c8_i32 = arith.constant 8 : i32
        %45 = arith.muli %arg9, %c8_i32 : i32
        %c0_i32_32 = arith.constant 0 : i32
        %46 = arith.addi %45, %c0_i32_32 : i32
        %47 = arith.addi %43, %46 : i32
        %c15_i32 = arith.constant 15 : i32
        %48 = arith.minsi %47, %c15_i32 : i32
        %49 = arith.index_cast %47 : i32 to index
        %50 = memref.load %arg2[%49] : memref<32xi32, #tpu.memory_space<smem>>
        %c128_i32 = arith.constant 128 : i32
        %51 = arith.muli %50, %c128_i32 : i32
        %52 = tpu.assume_multiple %51, 128 : i32
        %53 = tpu.memref_slice %arg5[%48, %52] : memref<16x128xf32, #tpu.memory_space<any>> -> memref<1x128xf32, #tpu.memory_space<any>>
        %c0_i32_33 = arith.constant 0 : i32
        %54 = tpu.memref_slice %arg7[%42, %46, %c0_i32_33] : memref<2x16x128xf32, #tpu.memory_space<vmem>> -> memref<1x1x128xf32, #tpu.memory_space<vmem>>
        %55 = tpu.memref_squeeze %54 : memref<1x1x128xf32, #tpu.memory_space<vmem>> -> memref<1x128xf32, #tpu.memory_space<vmem>>
        %56 = tpu.memref_slice %arg8[%42] : memref<2x!tpu.dma_semaphore, #tpu.memory_space<semaphore_mem>> -> memref<1x!tpu.dma_semaphore, #tpu.memory_space<semaphore_mem>>
        %57 = tpu.memref_squeeze %56 : memref<1x!tpu.dma_semaphore, #tpu.memory_space<semaphore_mem>> -> memref<!tpu.dma_semaphore, #tpu.memory_space<semaphore_mem>>
        tpu.enqueue_dma source(%53 : memref<1x128xf32, #tpu.memory_space<any>>) target(%55 : memref<1x128xf32, #tpu.memory_space<vmem>>) target_semaphore(%57 : memref<!tpu.dma_semaphore, #tpu.memory_space<semaphore_mem>>)
        %c8_i32_34 = arith.constant 8 : i32
        %58 = arith.muli %arg9, %c8_i32_34 : i32
        %c1_i32_35 = arith.constant 1 : i32
        %59 = arith.addi %58, %c1_i32_35 : i32
        %60 = arith.addi %43, %59 : i32
        %c15_i32_36 = arith.constant 15 : i32
        %61 = arith.minsi %60, %c15_i32_36 : i32
        %62 = arith.index_cast %60 : i32 to index
        %63 = memref.load %arg2[%62] : memref<32xi32, #tpu.memory_space<smem>>
        %c128_i32_37 = arith.constant 128 : i32
        %64 = arith.muli %63, %c128_i32_37 : i32
        %65 = tpu.assume_multiple %64, 128 : i32
        %66 = tpu.memref_slice %arg5[%61, %65] : memref<16x128xf32, #tpu.memory_space<any>> -> memref<1x128xf32, #tpu.memory_space<any>>
        %c0_i32_38 = arith.constant 0 : i32
        %67 = tpu.memref_slice %arg7[%42, %59, %c0_i32_38] : memref<2x16x128xf32, #tpu.memory_space<vmem>> -> memref<1x1x128xf32, #tpu.memory_space<vmem>>
        %68 = tpu.memref_squeeze %67 : memref<1x1x128xf32, #tpu.memory_space<vmem>> -> memref<1x128xf32, #tpu.memory_space<vmem>>
        %69 = tpu.memref_slice %arg8[%42] : memref<2x!tpu.dma_semaphore, #tpu.memory_space<semaphore_mem>> -> memref<1x!tpu.dma_semaphore, #tpu.memory_space<semaphore_mem>>
        %70 = tpu.memref_squeeze %69 : memref<1x!tpu.dma_semaphore, #tpu.memory_space<semaphore_mem>> -> memref<!tpu.dma_semaphore, #tpu.memory_space<semaphore_mem>>
        tpu.enqueue_dma source(%66 : memref<1x128xf32, #tpu.memory_space<any>>) target(%68 : memref<1x128xf32, #tpu.memory_space<vmem>>) target_semaphore(%70 : memref<!tpu.dma_semaphore, #tpu.memory_space<semaphore_mem>>)
        %c8_i32_39 = arith.constant 8 : i32
        %71 = arith.muli %arg9, %c8_i32_39 : i32
        %c2_i32_40 = arith.constant 2 : i32
        %72 = arith.addi %71, %c2_i32_40 : i32
        %73 = arith.addi %43, %72 : i32
        %c15_i32_41 = arith.constant 15 : i32
        %74 = arith.minsi %73, %c15_i32_41 : i32
        %75 = arith.index_cast %73 : i32 to index
        %76 = memref.load %arg2[%75] : memref<32xi32, #tpu.memory_space<smem>>
        %c128_i32_42 = arith.constant 128 : i32
        %77 = arith.muli %76, %c128_i32_42 : i32
        %78 = tpu.assume_multiple %77, 128 : i32
        %79 = tpu.memref_slice %arg5[%74, %78] : memref<16x128xf32, #tpu.memory_space<any>> -> memref<1x128xf32, #tpu.memory_space<any>>
        %c0_i32_43 = arith.constant 0 : i32
        %80 = tpu.memref_slice %arg7[%42, %72, %c0_i32_43] : memref<2x16x128xf32, #tpu.memory_space<vmem>> -> memref<1x1x128xf32, #tpu.memory_space<vmem>>
        %81 = tpu.memref_squeeze %80 : memref<1x1x128xf32, #tpu.memory_space<vmem>> -> memref<1x128xf32, #tpu.memory_space<vmem>>
        %82 = tpu.memref_slice %arg8[%42] : memref<2x!tpu.dma_semaphore, #tpu.memory_space<semaphore_mem>> -> memref<1x!tpu.dma_semaphore, #tpu.memory_space<semaphore_mem>>
        %83 = tpu.memref_squeeze %82 : memref<1x!tpu.dma_semaphore, #tpu.memory_space<semaphore_mem>> -> memref<!tpu.dma_semaphore, #tpu.memory_space<semaphore_mem>>
        tpu.enqueue_dma source(%79 : memref<1x128xf32, #tpu.memory_space<any>>) target(%81 : memref<1x128xf32, #tpu.memory_space<vmem>>) target_semaphore(%83 : memref<!tpu.dma_semaphore, #tpu.memory_space<semaphore_mem>>)
        %c8_i32_44 = arith.constant 8 : i32
        %84 = arith.muli %arg9, %c8_i32_44 : i32
        %c3_i32 = arith.constant 3 : i32
        %85 = arith.addi %84, %c3_i32 : i32
        %86 = arith.addi %43, %85 : i32
        %c15_i32_45 = arith.constant 15 : i32
        %87 = arith.minsi %86, %c15_i32_45 : i32
        %88 = arith.index_cast %86 : i32 to index
        %89 = memref.load %arg2[%88] : memref<32xi32, #tpu.memory_space<smem>>
        %c128_i32_46 = arith.constant 128 : i32
        %90 = arith.muli %89, %c128_i32_46 : i32
        %91 = tpu.assume_multiple %90, 128 : i32
        %92 = tpu.memref_slice %arg5[%87, %91] : memref<16x128xf32, #tpu.memory_space<any>> -> memref<1x128xf32, #tpu.memory_space<any>>
        %c0_i32_47 = arith.constant 0 : i32
        %93 = tpu.memref_slice %arg7[%42, %85, %c0_i32_47] : memref<2x16x128xf32, #tpu.memory_space<vmem>> -> memref<1x1x128xf32, #tpu.memory_space<vmem>>
        %94 = tpu.memref_squeeze %93 : memref<1x1x128xf32, #tpu.memory_space<vmem>> -> memref<1x128xf32, #tpu.memory_space<vmem>>
        %95 = tpu.memref_slice %arg8[%42] : memref<2x!tpu.dma_semaphore, #tpu.memory_space<semaphore_mem>> -> memref<1x!tpu.dma_semaphore, #tpu.memory_space<semaphore_mem>>
        %96 = tpu.memref_squeeze %95 : memref<1x!tpu.dma_semaphore, #tpu.memory_space<semaphore_mem>> -> memref<!tpu.dma_semaphore, #tpu.memory_space<semaphore_mem>>
        tpu.enqueue_dma source(%92 : memref<1x128xf32, #tpu.memory_space<any>>) target(%94 : memref<1x128xf32, #tpu.memory_space<vmem>>) target_semaphore(%96 : memref<!tpu.dma_semaphore, #tpu.memory_space<semaphore_mem>>)
        %c8_i32_48 = arith.constant 8 : i32
        %97 = arith.muli %arg9, %c8_i32_48 : i32
        %c4_i32 = arith.constant 4 : i32
        %98 = arith.addi %97, %c4_i32 : i32
        %99 = arith.addi %43, %98 : i32
        %c15_i32_49 = arith.constant 15 : i32
        %100 = arith.minsi %99, %c15_i32_49 : i32
        %101 = arith.index_cast %99 : i32 to index
        %102 = memref.load %arg2[%101] : memref<32xi32, #tpu.memory_space<smem>>
        %c128_i32_50 = arith.constant 128 : i32
        %103 = arith.muli %102, %c128_i32_50 : i32
        %104 = tpu.assume_multiple %103, 128 : i32
        %105 = tpu.memref_slice %arg5[%100, %104] : memref<16x128xf32, #tpu.memory_space<any>> -> memref<1x128xf32, #tpu.memory_space<any>>
        %c0_i32_51 = arith.constant 0 : i32
        %106 = tpu.memref_slice %arg7[%42, %98, %c0_i32_51] : memref<2x16x128xf32, #tpu.memory_space<vmem>> -> memref<1x1x128xf32, #tpu.memory_space<vmem>>
        %107 = tpu.memref_squeeze %106 : memref<1x1x128xf32, #tpu.memory_space<vmem>> -> memref<1x128xf32, #tpu.memory_space<vmem>>
        %108 = tpu.memref_slice %arg8[%42] : memref<2x!tpu.dma_semaphore, #tpu.memory_space<semaphore_mem>> -> memref<1x!tpu.dma_semaphore, #tpu.memory_space<semaphore_mem>>
        %109 = tpu.memref_squeeze %108 : memref<1x!tpu.dma_semaphore, #tpu.memory_space<semaphore_mem>> -> memref<!tpu.dma_semaphore, #tpu.memory_space<semaphore_mem>>
        tpu.enqueue_dma source(%105 : memref<1x128xf32, #tpu.memory_space<any>>) target(%107 : memref<1x128xf32, #tpu.memory_space<vmem>>) target_semaphore(%109 : memref<!tpu.dma_semaphore, #tpu.memory_space<semaphore_mem>>)
        %c8_i32_52 = arith.constant 8 : i32
        %110 = arith.muli %arg9, %c8_i32_52 : i32
        %c5_i32 = arith.constant 5 : i32
        %111 = arith.addi %110, %c5_i32 : i32
        %112 = arith.addi %43, %111 : i32
        %c15_i32_53 = arith.constant 15 : i32
        %113 = arith.minsi %112, %c15_i32_53 : i32
        %114 = arith.index_cast %112 : i32 to index
        %115 = memref.load %arg2[%114] : memref<32xi32, #tpu.memory_space<smem>>
        %c128_i32_54 = arith.constant 128 : i32
        %116 = arith.muli %115, %c128_i32_54 : i32
        %117 = tpu.assume_multiple %116, 128 : i32
        %118 = tpu.memref_slice %arg5[%113, %117] : memref<16x128xf32, #tpu.memory_space<any>> -> memref<1x128xf32, #tpu.memory_space<any>>
        %c0_i32_55 = arith.constant 0 : i32
        %119 = tpu.memref_slice %arg7[%42, %111, %c0_i32_55] : memref<2x16x128xf32, #tpu.memory_space<vmem>> -> memref<1x1x128xf32, #tpu.memory_space<vmem>>
        %120 = tpu.memref_squeeze %119 : memref<1x1x128xf32, #tpu.memory_space<vmem>> -> memref<1x128xf32, #tpu.memory_space<vmem>>
        %121 = tpu.memref_slice %arg8[%42] : memref<2x!tpu.dma_semaphore, #tpu.memory_space<semaphore_mem>> -> memref<1x!tpu.dma_semaphore, #tpu.memory_space<semaphore_mem>>
        %122 = tpu.memref_squeeze %121 : memref<1x!tpu.dma_semaphore, #tpu.memory_space<semaphore_mem>> -> memref<!tpu.dma_semaphore, #tpu.memory_space<semaphore_mem>>
        tpu.enqueue_dma source(%118 : memref<1x128xf32, #tpu.memory_space<any>>) target(%120 : memref<1x128xf32, #tpu.memory_space<vmem>>) target_semaphore(%122 : memref<!tpu.dma_semaphore, #tpu.memory_space<semaphore_mem>>)
        %c8_i32_56 = arith.constant 8 : i32
        %123 = arith.muli %arg9, %c8_i32_56 : i32
        %c6_i32 = arith.constant 6 : i32
        %124 = arith.addi %123, %c6_i32 : i32
        %125 = arith.addi %43, %124 : i32
        %c15_i32_57 = arith.constant 15 : i32
        %126 = arith.minsi %125, %c15_i32_57 : i32
        %127 = arith.index_cast %125 : i32 to index
        %128 = memref.load %arg2[%127] : memref<32xi32, #tpu.memory_space<smem>>
        %c128_i32_58 = arith.constant 128 : i32
        %129 = arith.muli %128, %c128_i32_58 : i32
        %130 = tpu.assume_multiple %129, 128 : i32
        %131 = tpu.memref_slice %arg5[%126, %130] : memref<16x128xf32, #tpu.memory_space<any>> -> memref<1x128xf32, #tpu.memory_space<any>>
        %c0_i32_59 = arith.constant 0 : i32
        %132 = tpu.memref_slice %arg7[%42, %124, %c0_i32_59] : memref<2x16x128xf32, #tpu.memory_space<vmem>> -> memref<1x1x128xf32, #tpu.memory_space<vmem>>
        %133 = tpu.memref_squeeze %132 : memref<1x1x128xf32, #tpu.memory_space<vmem>> -> memref<1x128xf32, #tpu.memory_space<vmem>>
        %134 = tpu.memref_slice %arg8[%42] : memref<2x!tpu.dma_semaphore, #tpu.memory_space<semaphore_mem>> -> memref<1x!tpu.dma_semaphore, #tpu.memory_space<semaphore_mem>>
        %135 = tpu.memref_squeeze %134 : memref<1x!tpu.dma_semaphore, #tpu.memory_space<semaphore_mem>> -> memref<!tpu.dma_semaphore, #tpu.memory_space<semaphore_mem>>
        tpu.enqueue_dma source(%131 : memref<1x128xf32, #tpu.memory_space<any>>) target(%133 : memref<1x128xf32, #tpu.memory_space<vmem>>) target_semaphore(%135 : memref<!tpu.dma_semaphore, #tpu.memory_space<semaphore_mem>>)
        %c8_i32_60 = arith.constant 8 : i32
        %136 = arith.muli %arg9, %c8_i32_60 : i32
        %c7_i32 = arith.constant 7 : i32
        %137 = arith.addi %136, %c7_i32 : i32
        %138 = arith.addi %43, %137 : i32
        %c15_i32_61 = arith.constant 15 : i32
        %139 = arith.minsi %138, %c15_i32_61 : i32
        %140 = arith.index_cast %138 : i32 to index
        %141 = memref.load %arg2[%140] : memref<32xi32, #tpu.memory_space<smem>>
        %c128_i32_62 = arith.constant 128 : i32
        %142 = arith.muli %141, %c128_i32_62 : i32
        %143 = tpu.assume_multiple %142, 128 : i32
        %144 = tpu.memref_slice %arg5[%139, %143] : memref<16x128xf32, #tpu.memory_space<any>> -> memref<1x128xf32, #tpu.memory_space<any>>
        %c0_i32_63 = arith.constant 0 : i32
        %145 = tpu.memref_slice %arg7[%42, %137, %c0_i32_63] : memref<2x16x128xf32, #tpu.memory_space<vmem>> -> memref<1x1x128xf32, #tpu.memory_space<vmem>>
        %146 = tpu.memref_squeeze %145 : memref<1x1x128xf32, #tpu.memory_space<vmem>> -> memref<1x128xf32, #tpu.memory_space<vmem>>
        %147 = tpu.memref_slice %arg8[%42] : memref<2x!tpu.dma_semaphore, #tpu.memory_space<semaphore_mem>> -> memref<1x!tpu.dma_semaphore, #tpu.memory_space<semaphore_mem>>
        %148 = tpu.memref_squeeze %147 : memref<1x!tpu.dma_semaphore, #tpu.memory_space<semaphore_mem>> -> memref<!tpu.dma_semaphore, #tpu.memory_space<semaphore_mem>>
        tpu.enqueue_dma source(%144 : memref<1x128xf32, #tpu.memory_space<any>>) target(%146 : memref<1x128xf32, #tpu.memory_space<vmem>>) target_semaphore(%148 : memref<!tpu.dma_semaphore, #tpu.memory_space<semaphore_mem>>)
      }
      %c2_i32_31 = arith.constant 2 : i32
    } else {
    }
    %14 = arith.index_cast %0 : i32 to index
    %c0 = arith.constant 0 : index
    %c0_8 = arith.constant 0 : index
    %15 = vector.load %arg7[%14, %c0, %c0_8] : memref<2x16x128xf32, #tpu.memory_space<vmem>>, vector<1x16x128xf32>
    %16 = vector.shape_cast %15 : vector<1x16x128xf32> to vector<16x128xf32>
    %17 = tpu.iota {dimensions = array<i32: 1>} : vector<16x128xi32>
    %c0_9 = arith.constant 0 : index
    %c0_10 = arith.constant 0 : index
    %c0_11 = arith.constant 0 : index
    %c0_12 = arith.constant 0 : index
    %18 = vector.load %arg3[%c0_9, %c0_10, %c0_11, %c0_12] : memref<1x1x16x1xi32, #tpu.memory_space<vmem>>, vector<1x1x16x1xi32>
    %19 = vector.shape_cast %18 : vector<1x1x16x1xi32> to vector<16x1xi32>
    %20 = vector.broadcast %19 : vector<16x1xi32> to vector<16x128xi32>
    %21 = arith.cmpi eq, %17, %20 : vector<16x128xi32>
    %cst = arith.constant 0.000000e+00 : f32
    %22 = vector.broadcast %cst : f32 to vector<16x128xf32>
    %23 = arith.select %21, %16, %22 : vector<16x128xi1>, vector<16x128xf32>
    %cst_13 = arith.constant dense<0.000000e+00> : vector<16xf32>
    %24 = vector.multi_reduction <add>, %23, %cst_13 [1] : vector<16x128xf32> to vector<16xf32>
    %25 = vector.shape_cast %24 : vector<16xf32> to vector<16x1xf32>
    %c0_14 = arith.constant 0 : index
    %c0_15 = arith.constant 0 : index
    %c0_16 = arith.constant 0 : index
    %26 = vector.load %arg6[%c0_14, %c0_15, %c0_16] : memref<1x1x1xf32, #tpu.memory_space<vmem>>, vector<1x1x1xf32>
    %c0_17 = arith.constant 0 : index
    %c0_18 = arith.constant 0 : index
    %c0_19 = arith.constant 0 : index
    %c0_20 = arith.constant 0 : index
    %27 = vector.load %arg4[%c0_17, %c0_18, %c0_19, %c0_20] : memref<1x1x16x1xf32, #tpu.memory_space<vmem>>, vector<1x1x16x1xf32>
    %28 = vector.shape_cast %27 : vector<1x1x16x1xf32> to vector<16x1xf32>
    %29 = arith.mulf %25, %28 : vector<16x1xf32>
    %30 = vector.shape_cast %29 : vector<16x1xf32> to vector<1x16x1xf32>
    %cst_21 = arith.constant dense<0.000000e+00> : vector<1xf32>
    %31 = vector.multi_reduction <add>, %30, %cst_21 [1, 2] : vector<1x16x1xf32> to vector<1xf32>
    %32 = vector.shape_cast %31 : vector<1xf32> to vector<1x1x1xf32>
    %33 = vector.extract %32[0, 0, 0] : f32 from vector<1x1x1xf32>
    %34 = vector.broadcast %33 : f32 to vector<1x1xf32>
    %35 = vector.shape_cast %34 : vector<1x1xf32> to vector<1x1x1xf32>
    %36 = arith.addf %26, %35 : vector<1x1x1xf32>
    %c0_22 = arith.constant 0 : index
    %c0_23 = arith.constant 0 : index
    %c0_24 = arith.constant 0 : index
    %37 = vector.load %arg6[%c0_22, %c0_23, %c0_24] : memref<1x1x1xf32, #tpu.memory_space<vmem>>, vector<1x1x1xf32>
    tpu.vector_store %arg6[%c0_22, %c0_23, %c0_24], %36 {strides = array<i32>} : memref<1x1x1xf32, #tpu.memory_space<vmem>>, vector<1x1x1xf32>,
    return
  }
  func.func @transform_0(%arg0: i32, %arg1: i32, %arg2: memref<32xi32, #tpu.memory_space<smem>>) -> (i32, i32, i32, i32) {
    %c0_i32 = arith.constant 0 : i32
    %c0_i32_0 = arith.constant 0 : i32
    %c0_i32_1 = arith.constant 0 : i32
    return %arg0, %arg1, %c0_i32, %c0_i32_0 : i32, i32, i32, i32
  }
  func.func @transform_1(%arg0: i32, %arg1: i32, %arg2: memref<32xi32, #tpu.memory_space<smem>>) -> (i32, i32, i32, i32) {
    %c0_i32 = arith.constant 0 : i32
    %c0_i32_0 = arith.constant 0 : i32
    %c0_i32_1 = arith.constant 0 : i32
    return %arg0, %arg1, %c0_i32, %c0_i32_0 : i32, i32, i32, i32
  }
  func.func @transform_3(%arg0: i32, %arg1: i32, %arg2: memref<32xi32, #tpu.memory_space<smem>>) -> (i32, i32, i32) {
    %c0_i32 = arith.constant 0 : i32
    %c0_i32_0 = arith.constant 0 : i32
    %c0_i32_1 = arith.constant 0 : i32
    return %arg0, %c0_i32, %c0_i32_0 : i32, i32, i32
  }
}

</mosaic_0001>

<bundles_post_ra>
// kernel: tpu_custom_call.1
= control target key start
LH: loop header
LB: loop body
LE: loop exit
PB: predicated region body
PF: predicated region fallthrough
CT: control target
= control target key end

     0   :  { %s1920_s0 = inlined_call_operand.vmem [shape: s32[32], index: 0, kind: input, shape index: {}]   ;;  %s1921_s1 = inlined_call_operand.vmem [shape: s32[2,1,16,1], index: 1, kind: input, shape index: {}]   ;;  %s1922_s2 = inlined_call_operand.vmem [shape: f32[2,1,16,1], index: 2, kind: input, shape index: {}]   ;;  %s1923_s3 = inlined_call_operand.vmem [shape: f32[16,128], index: 3, kind: input, shape index: {}]   ;;  %s1924_s4 = inlined_call_operand.vmem [shape: f32[2,1,1], index: 4, kind: output, shape index: {}]  }
   0x1   :  { %s9_s17 = sshll.u32 %s1920_s0, 4  ;;  %s10_s17 = int_to_ptr.vmem [resolvable:$true] %s9_s17 }
   0x2   :  { %s1726_s18 = scalar_lea.vmem %s10_s17, 16  ;;  %p1731_p1 = scmp.lt.s32.totalorder %s10_s17, %s10_s17 }
   0x3   :  { %p1727_p0 = scmp.ne.s32.totalorder %s10_s17, %s1726_s18  ;;  %p1732_p2 = scmp.lt.s32.totalorder %s1726_s18, %s1726_s18 }
   0x5   :  { %p1733_p3 = por %p1732_p2, %p1731_p1 }
   0x7   :  { %p1734_p4 = pnand %p1733_p3, %p1727_p0 }
   0x9   :  { %1737 = shalt.err (!%p1734_p4)  }
   0xa   :  { %s1774_s19 = smov [#allocation5]  }
   0xb   :  { %12 = dma.vmem_to_smem %s10_s17, 16, %s1774_s19, [#allocation4] }
   0xc   :  { %1754 = dma.done.wait [#allocation4], 16 }
   0xd   :  { %1755 = vsyncadd [#allocation4], 4294967280 }
   0xe   :  { %14 = sfence }
   0xf   :  { %s1805_s20 = smov 0   ;;  %s1807_s21 = smov 0  }
  0x10   :  { %s1809_s22 = smov 0  }
  0x11 LB: > { %s32_s0 = sadd.s32 1, %s1764_s21  ;;  %p1559_p5 = scmp.ge.s32.totalorder %s1768_s22, 1  ;;  %s1768_s22 = sphi %s1809_s22, %s20_s22   ;;  %s1764_s21 = sphi %s1807_s21, %s1926_s21   ;;  %s1760_s20 = sphi %s1805_s20, %s1925_s20  }
  0x12   : > { %p34_p6 = scmp.ge.s32.totalorder %s32_s0, 2  ;;  %p154_p7 = scmp.lt.s32.totalorder %s1768_s22, 3 }
  0x14   : > { %s1928_s0 = smov (%p34_p6, %s32_s0), 0  ;;  %p155_p8 = pnand %p1559_p5, %p154_p7 }
  0x15   : > { %p187_p9 = scmp.lt.s32.totalorder (!%p155_p8), %s1760_s20, 1  ;;  %s1823_s23 = sshll.u32 (!%p155_p8), %s1760_s20, 4  ;;  %vm213_vm0 = vcmask (!%p155_p8), 0   ;;  %v1775_v0 = vmov (!%p155_p8), 0.0  }
  0x16   : > { %158 = sbr.rel (%p155_p8) target bundleno = 646 (0x286), region = 28  ;;  %s1842_s8 = smov (!%p155_p8), 0  }
  0x1d   : > { %s1930_s20 = smov (!%p187_p9, %s1760_s20), 1 }
  0x1e   : > { %s1638_s24 = sshll.u32 %s1930_s20, 4  ;;  %s1828_s27 = scalar_lea.vmem %s1924_s4, %s1930_s20 }
  0x1f   : > { %s1833_s30 = scalar_lea.vmem %s1921_s1, %s1638_s24  ;;  %s1838_s7 = scalar_lea.vmem %s1922_s2, %s1638_s24  ;;  %214 = vst.msk [vmem:[%s1828_s27] sm:$0x1] %vm213_vm0, %v1775_v0 }
  0x20 LB: >> { %s1848_s9 = sshll.u32 %s1772_s8, 3  ;;  %s1772_s8 = sphi %s1842_s8, %s221_s8  }
  0x21   : >> { %s223_s10 = sadd.s32 %s1848_s9, %s1823_s23  ;;  %s1856_s18 = scalar_lea.vmem [#allocation2], %s1848_s9 }
  0x22   : >> { %p224_p10 = scmp.lt.s32.totalorder %s223_s10, 15  ;;  %s226_s11 = sld [smem:[#allocation5 + %s223_s10]] }
  0x24   : >> { %s1932_s10 = smov (!%p224_p10, %s223_s10), 15 }
  0x28   : >> { %s1566_s12 = sshll.u32 %s226_s11, 7 }
  0x29   : >> { %s228_s13 = sshra.s32 %s1566_s12, 7 }
  0x2a   : >> { %s230_s14 = sadd.s32 %s228_s13, %s1932_s10 }
  0x2b   : >> { %s231_s17 = scalar_lea.vmem %s1923_s3, %s230_s14 }
  0x2c   : >> { %v250_v1 = vld [vmem:[%s231_s17] sm:$0x1] }
  0x2d   : >> { %251 = vst [vmem:[%s1856_s18] sm:$0x1] %v250_v1 }
  0x2e   : >> { %276 = vsyncadd [#allocation3], 16  ;;  %s277_s19 = sadd.s32 1, %s1848_s9 }
  0x2f   : >> { %s278_s20 = sadd.s32 %s1823_s23, %s277_s19 }
  0x30   : >> { %p279_p11 = scmp.lt.s32.totalorder %s278_s20, 15  ;;  %s281_s24 = sld [smem:[#allocation5 + %s278_s20]] }
  0x32   : >> { %s1934_s20 = smov (!%p279_p11, %s278_s20), 15 }
  0x36   : >> { %s1567_s25 = sshll.u32 %s281_s24, 7 }
  0x37   : >> { %s283_s26 = sshra.s32 %s1567_s25, 7 }
  0x38   : >> { %s285_s28 = sadd.s32 %s283_s26, %s1934_s20 }
  0x39   : >> { %s286_s6 = scalar_lea.vmem %s1923_s3, %s285_s28 }
  0x3a   : >> { %v305_v2 = vld [vmem:[%s286_s6] sm:$0x1] }
  0x3b   : >> { %1570 = vst [vmem:[%s1856_s18 + $0x1] sm:$0x1] %v305_v2 }
  0x3c   : >> { %331 = vsyncadd [#allocation3], 16  ;;  %s332_s10 = sadd.s32 2, %s1848_s9 }
  0x3d   : >> { %s333_s11 = sadd.s32 %s1823_s23, %s332_s10 }
  0x3e   : >> { %p334_p12 = scmp.lt.s32.totalorder %s333_s11, 15  ;;  %s336_s12 = sld [smem:[#allocation5 + %s333_s11]] }
  0x40   : >> { %s1936_s11 = smov (!%p334_p12, %s333_s11), 15 }
  0x44   : >> { %s1571_s13 = sshll.u32 %s336_s12, 7 }
  0x45   : >> { %s338_s14 = sshra.s32 %s1571_s13, 7 }
  0x46   : >> { %s340_s15 = sadd.s32 %s338_s14, %s1936_s11 }
  0x47   : >> { %s341_s19 = scalar_lea.vmem %s1923_s3, %s340_s15 }
  0x48   : >> { %v360_v3 = vld [vmem:[%s341_s19] sm:$0x1] }
  0x49   : >> { %1574 = vst [vmem:[%s1856_s18 + $0x2] sm:$0x1] %v360_v3 }
  0x4a   : >> { %386 = vsyncadd [#allocation3], 16  ;;  %s387_s20 = sadd.s32 3, %s1848_s9 }
  0x4b   : >> { %s388_s24 = sadd.s32 %s1823_s23, %s387_s20 }
  0x4c   : >> { %p389_p13 = scmp.lt.s32.totalorder %s388_s24, 15  ;;  %s391_s25 = sld [smem:[#allocation5 + %s388_s24]] }
  0x4e   : >> { %s1938_s24 = smov (!%p389_p13, %s388_s24), 15 }
  0x52   : >> { %s1575_s26 = sshll.u32 %s391_s25, 7 }
  0x53   : >> { %s393_s28 = sshra.s32 %s1575_s26, 7 }
  0x54   : >> { %s395_s29 = sadd.s32 %s393_s28, %s1938_s24 }
  0x55   : >> { %s396_s10 = scalar_lea.vmem %s1923_s3, %s395_s29 }
  0x56   : >> { %v415_v4 = vld [vmem:[%s396_s10] sm:$0x1] }
  0x57   : >> { %1578 = vst [vmem:[%s1856_s18 + $0x3] sm:$0x1] %v415_v4 }
  0x58   : >> { %441 = vsyncadd [#allocation3], 16  ;;  %s442_s11 = sadd.s32 4, %s1848_s9 }
  0x59   : >> { %s443_s12 = sadd.s32 %s1823_s23, %s442_s11 }
  0x5a   : >> { %p444_p0 = scmp.lt.s32.totalorder %s443_s12, 15  ;;  %s446_s13 = sld [smem:[#allocation5 + %s443_s12]] }
  0x5c   : >> { %s1940_s12 = smov (!%p444_p0, %s443_s12), 15 }
  0x60   : >> { %s1579_s14 = sshll.u32 %s446_s13, 7 }
  0x61   : >> { %s448_s15 = sshra.s32 %s1579_s14, 7 }
  0x62   : >> { %s450_s16 = sadd.s32 %s448_s15, %s1940_s12 }
  0x63   : >> { %s451_s20 = scalar_lea.vmem %s1923_s3, %s450_s16 }
  0x64   : >> { %v470_v5 = vld [vmem:[%s451_s20] sm:$0x1] }
  0x65   : >> { %1582 = vst [vmem:[%s1856_s18 + $0x4] sm:$0x1] %v470_v5 }
  0x66   : >> { %496 = vsyncadd [#allocation3], 16  ;;  %s497_s24 = sadd.s32 5, %s1848_s9 }
  0x67   : >> { %s498_s25 = sadd.s32 %s1823_s23, %s497_s24 }
  0x68   : >> { %p499_p1 = scmp.lt.s32.totalorder %s498_s25, 15  ;;  %s501_s26 = sld [smem:[#allocation5 + %s498_s25]] }
  0x6a   : >> { %s1942_s25 = smov (!%p499_p1, %s498_s25), 15 }
  0x6e   : >> { %s1583_s28 = sshll.u32 %s501_s26, 7 }
  0x6f   : >> { %s503_s29 = sshra.s32 %s1583_s28, 7 }
  0x70   : >> { %s505_s5 = sadd.s32 %s503_s29, %s1942_s25 }
  0x71   : >> { %s506_s11 = scalar_lea.vmem %s1923_s3, %s505_s5 }
  0x72   : >> { %v525_v6 = vld [vmem:[%s506_s11] sm:$0x1] }
  0x73   : >> { %1586 = vst [vmem:[%s1856_s18 + $0x5] sm:$0x1] %v525_v6 }
  0x74   : >> { %551 = vsyncadd [#allocation3], 16  ;;  %s552_s12 = sadd.s32 6, %s1848_s9 }
  0x75   : >> { %s553_s13 = sadd.s32 %s1823_s23, %s552_s12 }
  0x76   : >> { %p554_p2 = scmp.lt.s32.totalorder %s553_s13, 15  ;;  %s556_s14 = sld [smem:[#allocation5 + %s553_s13]] }
  0x78   : >> { %s1944_s13 = smov (!%p554_p2, %s553_s13), 15 }
  0x7c   : >> { %s1587_s15 = sshll.u32 %s556_s14, 7 }
  0x7d   : >> { %s558_s16 = sshra.s32 %s1587_s15, 7 }
  0x7e   : >> { %s560_s17 = sadd.s32 %s558_s16, %s1944_s13 }
  0x7f   : >> { %s561_s24 = scalar_lea.vmem %s1923_s3, %s560_s17 }
  0x80   : >> { %v580_v7 = vld [vmem:[%s561_s24] sm:$0x1] }
  0x81   : >> { %1590 = vst [vmem:[%s1856_s18 + $0x6] sm:$0x1] %v580_v7 }
  0x82   : >> { %606 = vsyncadd [#allocation3], 16  ;;  %s607_s25 = sadd.s32 7, %s1848_s9 }
  0x83   : >> { %s608_s26 = sadd.s32 %s1823_s23, %s607_s25 }
  0x84   : >> { %p609_p3 = scmp.lt.s32.totalorder %s608_s26, 15  ;;  %s611_s28 = sld [smem:[#allocation5 + %s608_s26]] }
  0x86   : >> { %s1946_s26 = smov (!%p609_p3, %s608_s26), 15 }
  0x8a   : >> { %s1591_s29 = sshll.u32 %s611_s28, 7 }
  0x8b   : >> { %s613_s5 = sshra.s32 %s1591_s29, 7 }
  0x8c   : >> { %s615_s6 = sadd.s32 %s613_s5, %s1946_s26 }
  0x8d   : >> { %s616_s12 = scalar_lea.vmem %s1923_s3, %s615_s6 }
  0x8e   : >> { %v635_v8 = vld [vmem:[%s616_s12] sm:$0x1] }
  0x8f   : >> { %1594 = vst [vmem:[%s1856_s18 + $0x7] sm:$0x1] %v635_v8 }
  0x90   : >> { %661 = vsyncadd [#allocation3], 16  ;;  %s221_s8 = sadd.s32 1, %s1772_s8  }
  0x91   : >> { %p218_p4 = scmp.ge.s32.totalorder %s221_s8, 2  }
  0x93   : > { %220 = sbr.rel (!%p218_p4) target bundleno = 32 (0x20), region = 759 }
  0x9a   : > { %1756 = dma.done.wait [#allocation3], 256 }
  0x9b   : > { %1757 = vsyncadd [#allocation3], 4294967040  ;;  %v1776_v9 = vmov 0   ;;  %v1137_v10 = vld [vmem:[%s1833_s30] sm:$0xff]  ;;  %v1138_v11 = vld [vmem:[%s1833_s30 + $0x8] sm:$0xff]  ;;  %v1135_v12 = vlaneseq  ;;  %vm1158_vm3 = vcmask 7168  }
  0x9c   : > { %1725 = vset.pattern.permute.xlu0 %v1776_v9  ;;  %v1133_v14 = vld [vmem:[#allocation2] sm:$0xff]  ;;  %v1134_v17 = vld [vmem:[#allocation2 + $0x8] sm:$0xff] }
  0x9d   : > { %1140 = vperm.xlu0 %1725, %v1137_v10   ;;  %v1136_v13 = vand.u32 127, %v1135_v12  ;;  %v1154_v20 = vld [vmem:[%s1838_s7] sm:$0xff]  ;;  %v1155_v22 = vld [vmem:[%s1838_s7 + $0x8] sm:$0xff] }
  0x9e   : > { %v1153_v36 = vld [vmem:[%s1828_s27] sm:$0x1] }
  0xa1   : > { %1143 = vperm.xlu0 %1725, %v1138_v11  }
 0x11c   : > { %v1141_v15 = vpop.permute.xlu0 %1140 }
 0x11d   : > { %vm1145_vm1 = vcmp.eq.s32.totalorder %v1136_v13, %v1141_v15 }
 0x11e   : > { %v1147_v16 = vsel %vm1145_vm1, %v1133_v14, 0.0 }
 0x11f   : > { %1149 = vadd.xlane.f32.xlu1 %v1147_v16 }
 0x120   : > { %v1144_v18 = vpop.permute.xlu0 %1143 }
 0x121   : > { %vm1146_vm2 = vcmp.eq.s32.totalorder %v1136_v13, %v1144_v18 }
 0x122   : > { %v1148_v19 = vsel %vm1146_vm2, %v1134_v17, 0.0 }
 0x123   : > { %1151 = vadd.xlane.f32.xlu1 %v1148_v19 }
 0x1ac   : > { %v1150_v21 = vpop.xlane.xlu1 %1149 }
 0x1ad   : > { %v1156_v23 = vmul.f32 %v1154_v20, %v1150_v21 }
 0x1af   : > { %v1159_v26 = vsel %vm1158_vm3, %v1156_v23, 0.0 }
 0x1b0   : > { %v1152_v24 = vpop.xlane.xlu1 %1151 }
 0x1b1   : > { %v1157_v25 = vmul.f32 %v1155_v22, %v1152_v24 }
 0x1b3   : > { %v1160_v27 = vsel %vm1158_vm3, %v1157_v25, 0.0 }
 0x1b4   : > { %v1161_v28 = vadd.f32 %v1160_v27, %v1159_v26 }
 0x1b6   : > { %1162 = vadd.xlane.f32.xlu0 %v1161_v28 }
 0x243   : > { %v1163_v29 = vpop.xlane.xlu0 %1162 }
 0x244   : > { %v1164_v30 = vrot.slane %v1163_v29, 4 }
 0x246   : > { %v1165_v31 = vadd.f32 %v1164_v30, %v1163_v29 }
 0x248   : > { %v1166_v32 = vrot.slane %v1165_v31, 2 }
 0x24a   : > { %v1167_v33 = vadd.f32 %v1166_v32, %v1165_v31 }
 0x24c   : > { %v1168_v34 = vrot.slane %v1167_v33, 1 }
 0x24e   : > { %v1169_v35 = vadd.f32 %v1168_v34, %v1167_v33 }
 0x250   : > { %1688 = vpush %v1169_v35 }
 0x281   : > { %s1689_s23 = spop %1688 }
 0x282   : > { %v1171_v37 = vstv %s1689_s23 }
 0x283   : > { %v1172_v38 = vadd.f32 %v1171_v37, %v1153_v36 }
 0x285   : > { %1174 = vst.msk [vmem:[%s1828_s27] sm:$0x1] %vm213_vm0, %v1172_v38 }
 0x286 PF: > { %s20_s22 = sadd.s32 1, %s1768_s22   ;;  %s1925_s20 = smov %s1764_s21 }
 0x287   : > { %p17_p5 = scmp.ge.s32.totalorder %s20_s22, 4   ;;  %s1926_s21 = smov %s1928_s0 }
 0x289   :  { %19 = sbr.rel (!%p17_p5) target bundleno = 17 (0x11), region = 781 }
 0x290   :  { %1192 = vsyncmov [#allocation3] }
 0x293   :  { %s1193_s30 = vpop.sfrf %1192 }
 0x294   :  { %p1636_p6 = scmp.ne.s32.totalorder %s1193_s30, 0 }
 0x296   :  { %1197 = shalt.err (%p1636_p6)  }
 0x297   :  { %1199 = vsyncmov [#allocation3 + $0x1] }
 0x29a   :  { %s1200_s7 = vpop.sfrf %1199 }
 0x29b   :  { %p1637_p7 = scmp.ne.s32.totalorder %s1200_s7, 0 }
 0x29d   :  { %1204 = shalt.err (%p1637_p7)  }

</bundles_post_ra>
